<compile_context>
chip_gen: v7x
topology: tpu7x:2x2x1
jax: 0.10.0
libtpu: 0.0.40
codegen_flags: <defaults>
</compile_context>

<pallas_src>
import functools

import jax
import jax.numpy as jnp
from jax import lax
from jax.experimental import pallas as pl
from jax.experimental.pallas import tpu as pltpu

# Small, self-consistent model sizes (module default is 1024/1024; scaled down)
FC_OUT = 128      # fc_out_channels == LSTM input_size
HIDDEN = 128      # LSTM hidden_size
NUM_FCS = 2
NUM_LSTM_LAYERS = 2
T_CHUNK = 2       # LSTM time-chunk per grid step (use 8-16 at full scale)

_PAR = pltpu.CompilerParams(dimension_semantics=("parallel",))
_PAR_ARB = pltpu.CompilerParams(dimension_semantics=("parallel", "arbitrary"))


def _round_up(v, m):
    return ((v + m - 1) // m) * m


# ----------------------------------------------------------------------------
# Pallas kernels
# ----------------------------------------------------------------------------
def _fc_stack_kernel(x_ref, w0_ref, b0_ref, w1_ref, b1_ref, o_ref):
    """y = relu(x @ W0 + b0) @ W1 + b1, intermediate kept on-chip.
    x/W0/W1 are bf16; accumulation is f32; output written back in bf16."""
    h = jnp.dot(x_ref[...], w0_ref[...],
                preferred_element_type=jnp.float32) + b0_ref[...]
    h = jnp.maximum(h, 0.0)
    y = jnp.dot(h.astype(jnp.bfloat16), w1_ref[...],
                preferred_element_type=jnp.float32) + b1_ref[...]
    o_ref[...] = y.astype(o_ref.dtype)


def fc_stack_pallas(x, fc_w):
    """x: (n, d_in); fc_w = (W0t bf16 (d_in_pad, F), b0 (1,F) f32,
    W1t bf16 (F, F), b1 (1,F) f32). Returns (n, F) bf16."""
    w0, b0, w1, b1 = fc_w
    n = x.shape[0]
    d_in_pad = w0.shape[0]
    d_out = w1.shape[1]

    # bf16 before the pallas_call: halves the input DMA bytes.
    x = x.astype(jnp.bfloat16)
    if x.shape[1] < d_in_pad:                       # zero-pad feature dim
        x = jnp.pad(x, ((0, 0), (0, d_in_pad - x.shape[1])))

    # Row padding/tiling: bf16 sublane packing wants multiples of 16; aim for
    # >=2 grid steps when there is enough work so v7x can shard across its
    # two TensorCores; cap the row tile at 256 (matches the 256-wide MXU).
    n_pad = _round_up(max(n, 1), 16)
    if n_pad > 256:
        row_tile = 256
        n_pad = _round_up(n_pad, 256)
    elif n_pad >= 32:
        n_pad = _round_up(n_pad, 32)
        row_tile = n_pad // 2
    else:
        row_tile = n_pad
    if n_pad > n:
        x = jnp.pad(x, ((0, n_pad - n), (0, 0)))

    out = pl.pallas_call(
        _fc_stack_kernel,
        out_shape=jax.ShapeDtypeStruct((n_pad, d_out), jnp.bfloat16),
        grid=(n_pad // row_tile,),
        in_specs=[pl.BlockSpec((row_tile, d_in_pad), lambda i: (i, 0)),
                  pl.BlockSpec((d_in_pad, d_out), lambda i: (0, 0)),
                  pl.BlockSpec((1, d_out), lambda i: (0, 0)),
                  pl.BlockSpec((d_out, d_out), lambda i: (0, 0)),
                  pl.BlockSpec((1, d_out), lambda i: (0, 0))],
        out_specs=pl.BlockSpec((row_tile, d_out), lambda i: (i, 0)),
        compiler_params=_PAR,
    )(x, w0, b0, w1, b1)
    return out[:n]


def _lstm_batch_kernel(len_ref, seq_ref, wi0_ref, wh0_ref, b0_ref,
                       wi1_ref, wh1_ref, b1_ref, h_out_ref,
                       h0_ref, c0_ref, h1_ref, c1_ref, *, t_chunk, hidden):
    """Batched 2-layer LSTM, grid = (k_tiles, t_chunks) with time trailing.
    seq_ref: (t_chunk, K, D) bf16 slice of the padded sequences;
    len_ref: (K, 1) int32 true lengths; h/c state (f32) lives in scratch and
    is carried across time chunks; final top-layer hidden state is written
    (bf16) at the last chunk.  PyTorch gate order (i, f, g, o), zero init."""
    ti = pl.program_id(1)

    @pl.when(ti == 0)
    def _():
        z = jnp.zeros_like(h0_ref)
        h0_ref[...] = z
        c0_ref[...] = z
        h1_ref[...] = z
        c1_ref[...] = z

    lens = len_ref[...]                     # (K, 1) int32
    wi0 = wi0_ref[...]                      # (D, 4H) bf16
    wh0 = wh0_ref[...]                      # (H, 4H) bf16
    b0 = b0_ref[...]                        # (1, 4H) f32 (bih + bhh)
    wi1 = wi1_ref[...]                      # (H, 4H) bf16
    wh1 = wh1_ref[...]                      # (H, 4H) bf16
    b1 = b1_ref[...]
    k = h_out_ref.shape[0]
    t_base = ti * t_chunk

    def cell(inp, h, c, wi, wh, b):
        gates = (jnp.dot(inp.astype(jnp.bfloat16), wi,
                         preferred_element_type=jnp.float32)
                 + jnp.dot(h.astype(jnp.bfloat16), wh,
                           preferred_element_type=jnp.float32) + b)
        i = jax.nn.sigmoid(gates[:, 0 * hidden:1 * hidden])
        f = jax.nn.sigmoid(gates[:, 1 * hidden:2 * hidden])
        g = jnp.tanh(gates[:, 2 * hidden:3 * hidden])
        o = jax.nn.sigmoid(gates[:, 3 * hidden:4 * hidden])
        c_new = f * c + i * g
        h_new = o * jnp.tanh(c_new)
        return h_new, c_new

    def step(t, carry):
        h0, c0, h1, c1 = carry
        # One broadcast of the freeze-mask per timestep, reused by all 4
        # selects (JAX does not CSE broadcast_in_dim).
        valid = jnp.broadcast_to(lens > (t_base + t), (k, hidden))
        xt = seq_ref[t]                      # (K, D) bf16
        h0n, c0n = cell(xt, h0, c0, wi0, wh0, b0)
        h0 = jnp.where(valid, h0n, h0)
        c0 = jnp.where(valid, c0n, c0)
        h1n, c1n = cell(h0, h1, c1, wi1, wh1, b1)
        h1 = jnp.where(valid, h1n, h1)
        c1 = jnp.where(valid, c1n, c1)
        return h0, c0, h1, c1

    carry0 = (h0_ref[...], c0_ref[...], h1_ref[...], c1_ref[...])
    h0, c0, h1, c1 = lax.fori_loop(0, t_chunk, step, carry0, unroll=True)
    h0_ref[...] = h0
    c0_ref[...] = c0
    h1_ref[...] = h1
    c1_ref[...] = c1

    @pl.when(ti == pl.num_programs(1) - 1)
    def _():
        h_out_ref[...] = h1.astype(h_out_ref.dtype)


def lstm_batch_pallas(seqs, lengths, lstm_w):
    """seqs: (t_pad, k_pad, D) bf16; lengths: (k_pad, 1) int32.
    Returns final top-layer hidden states (k_pad, HIDDEN) bf16."""
    t_pad, k_pad, d = seqs.shape
    H = HIDDEN
    wi0, wh0, b0, wi1, wh1, b1 = lstm_w
    # Split K into 2 tiles when there is enough work so v7x's two TensorCores
    # both participate (k_pad is a multiple of 32 in that case -> bf16-clean).
    k_tile = k_pad // 2 if k_pad >= 32 else k_pad
    return pl.pallas_call(
        functools.partial(_lstm_batch_kernel, t_chunk=T_CHUNK, hidden=H),
        out_shape=jax.ShapeDtypeStruct((k_pad, H), jnp.bfloat16),
        grid=(k_pad // k_tile, t_pad // T_CHUNK),
        in_specs=[pl.BlockSpec((k_tile, 1), lambda ki, ti: (ki, 0)),
                  pl.BlockSpec((T_CHUNK, k_tile, d), lambda ki, ti: (ti, ki, 0)),
                  pl.BlockSpec((d, 4 * H), lambda ki, ti: (0, 0)),
                  pl.BlockSpec((H, 4 * H), lambda ki, ti: (0, 0)),
                  pl.BlockSpec((1, 4 * H), lambda ki, ti: (0, 0)),
                  pl.BlockSpec((H, 4 * H), lambda ki, ti: (0, 0)),
                  pl.BlockSpec((H, 4 * H), lambda ki, ti: (0, 0)),
                  pl.BlockSpec((1, 4 * H), lambda ki, ti: (0, 0))],
        out_specs=pl.BlockSpec((k_tile, H), lambda ki, ti: (ki, 0)),
        scratch_shapes=[pltpu.VMEM((k_tile, H), jnp.float32)] * 4,
        compiler_params=_PAR_ARB,
    )(lengths, seqs, wi0, wh0, b0, wi1, wh1, b1)


def _match_kernel(x_ref, h_ref, o_ref):
    # x: (m_pad, D) bf16, h: (k_lane, D) bf16 (row 0 = zero dummy entry).
    # Contract on the last dims (no host-side transpose of the RHS).
    o_ref[...] = lax.dot_general(
        x_ref[...], h_ref[...],
        dimension_numbers=(((1,), (1,)), ((), ())),
        preferred_element_type=jnp.float32)


def match_batch_pallas(x_all, h_all):
    """x_all: (B, m_pad, D) bf16, h_all: (B, k_lane, D) bf16
    -> (B, m_pad, k_lane) f32.  Row 0 of h_all is the 'non-match' dummy."""
    B, m_pad, d = x_all.shape
    k_lane = h_all.shape[1]
    return pl.pallas_call(
        _match_kernel,
        out_shape=jax.ShapeDtypeStruct((B, m_pad, k_lane), jnp.float32),
        grid=(B,),
        in_specs=[pl.BlockSpec((None, m_pad, d), lambda b: (b, 0, 0)),
                  pl.BlockSpec((None, k_lane, d), lambda b: (b, 0, 0))],
        out_specs=pl.BlockSpec((None, m_pad, k_lane), lambda b: (b, 0, 0)),
        compiler_params=_PAR,
    )(x_all, h_all)


# ----------------------------------------------------------------------------
# Parameters (deterministic, in-script; mirrors __init__ / init_weights shapes)
# ----------------------------------------------------------------------------
def init_params(key, d_in):
    ks = jax.random.split(key, 12)

    def nrm(k, shape):
        return jax.random.normal(k, shape, jnp.float32) * 0.01

    params = {
        'query_fcs': [
            (nrm(ks[0], (FC_OUT, d_in)), jnp.zeros((FC_OUT,), jnp.float32)),
            (nrm(ks[1], (FC_OUT, FC_OUT)), jnp.zeros((FC_OUT,), jnp.float32)),
        ],
        'in_fcs': [
            (nrm(ks[2], (FC_OUT, d_in)), jnp.zeros((FC_OUT,), jnp.float32)),
            (nrm(ks[3], (FC_OUT, FC_OUT)), jnp.zeros((FC_OUT,), jnp.float32)),
        ],
    }
    bound = 1.0 / float(jnp.sqrt(jnp.float32(HIDDEN)))

    def uni(k, shape):
        return jax.random.uniform(k, shape, jnp.float32, -bound, bound)

    params['lstm'] = {
        'wih0': uni(ks[4], (4 * HIDDEN, FC_OUT)),
        'whh0': uni(ks[5], (4 * HIDDEN, HIDDEN)),
        'bih0': uni(ks[6], (4 * HIDDEN,)),
        'bhh0': uni(ks[7], (4 * HIDDEN,)),
        'wih1': uni(ks[8], (4 * HIDDEN, HIDDEN)),
        'whh1': uni(ks[9], (4 * HIDDEN, HIDDEN)),
        'bih1': uni(ks[10], (4 * HIDDEN,)),
        'bhh1': uni(ks[11], (4 * HIDDEN,)),
    }
    return params


def prepare_params(params, d_in):
    """One-time weight prep (hoisted): transpose, pad, fuse biases, bf16-cast."""
    d_in_pad = _round_up(d_in, 128)

    def prep_fc(fcs):
        (w0, b0), (w1, b1) = fcs
        w0t = jnp.zeros((d_in_pad, w0.shape[0]), jnp.float32)
        w0t = w0t.at[:d_in].set(jnp.transpose(w0))      # zero rows for padding
        return (w0t.astype(jnp.bfloat16), b0.reshape(1, -1),
                jnp.transpose(w1).astype(jnp.bfloat16), b1.reshape(1, -1))

    lp = params['lstm']
    return {
        'query': prep_fc(params['query_fcs']),
        'in': prep_fc(params['in_fcs']),
        'lstm': (jnp.transpose(lp['wih0']).astype(jnp.bfloat16),
                 jnp.transpose(lp['whh0']).astype(jnp.bfloat16),
                 (lp['bih0'] + lp['bhh0']).reshape(1, -1),
                 jnp.transpose(lp['wih1']).astype(jnp.bfloat16),
                 jnp.transpose(lp['whh1']).astype(jnp.bfloat16),
                 (lp['bih1'] + lp['bhh1']).reshape(1, -1)),
    }


# ----------------------------------------------------------------------------
# Forward (TrackHeadTASUF.forward semantics)
# ----------------------------------------------------------------------------
def _split_rows(arr, sizes):
    out, off = [], 0
    for s in sizes:
        out.append(arr[off:off + s])
        off += s
    return out


def _build_lstm_batch(ref_x_dict_list, feat_dim):
    """Stack all (batch, pid) sequences on a (T_pad, K_pad, D) bf16 layout."""
    entries, spans = [], []
    for d in ref_x_dict_list:
        start = len(entries)
        for pid in sorted(d.keys()):
            entries.append(jnp.concatenate(d[pid], axis=0))     # (len_i, D) bf16
        spans.append((start, len(entries) - start))
    k = len(entries)
    t_max = max((int(e.shape[0]) for e in entries), default=1)
    t_pad = _round_up(max(t_max, 1), T_CHUNK)
    # K padding: multiple of 16 (bf16 sublane); multiple of 32 when large so
    # the LSTM grid can split K in half across TensorCores.
    k_pad = _round_up(max(k, 1), 32) if k > 16 else _round_up(max(k, 1), 16)

    if k == 0:
        return (jnp.zeros((t_pad, k_pad, feat_dim), jnp.bfloat16),
                jnp.zeros((k_pad, 1), jnp.int32), spans)

    cols = [jnp.pad(e, ((0, t_pad - e.shape[0]), (0, 0))) for e in entries]
    seqs = jnp.stack(cols, axis=1)                               # (T_pad, k, D)
    if k_pad > k:
        seqs = jnp.pad(seqs, ((0, 0), (0, k_pad - k), (0, 0)))
    lens = [int(e.shape[0]) for e in entries] + [0] * (k_pad - k)
    lengths = jnp.asarray(lens, jnp.int32).reshape(k_pad, 1)
    return seqs, lengths, spans


def track_head_forward(prepared, x, ref_x_list, x_n, ref_x_n_list, gt_pids_list):
    batch_size = len(x_n)
    for ref_x_n in ref_x_n_list:
        assert len(x_n) == len(ref_x_n)

    # Flatten NCHW ROI features -> (N, C*H*W)
    xf = x.reshape(x.shape[0], -1)
    ref_flat = [r.reshape(r.shape[0], -1) for r in ref_x_list]

    # Current-frame features through the fused query FC stack (1 call).
    xq = fc_stack_pallas(xf, prepared['query'])                   # (N, F) bf16

    # All reference frames concatenated through the fused in FC stack (1 call).
    ref_counts = [r.shape[0] for r in ref_flat]
    ref_all = fc_stack_pallas(jnp.concatenate(ref_flat, axis=0), prepared['in'])
    ref_f_list = _split_rows(ref_all, ref_counts)

    x_split = _split_rows(xq, x_n)
    ref_split_list = [_split_rows(r, n) for r, n in zip(ref_f_list, ref_x_n_list)]

    # Group reference features per batch element by gt_pid across ref frames
    # (pure Python-int bookkeeping -> glue).
    ref_x_dict_list = []
    for b in range(batch_size):
        d = {}
        for i, ref_gt_pids in enumerate(gt_pids_list[:-1]):
            for j, pid in enumerate(ref_gt_pids[b]):
                if pid == 0:
                    continue
                d.setdefault(int(pid), []).append(ref_split_list[i][b][j:j + 1])
        ref_x_dict_list.append(d)

    # ONE batched LSTM call over every (batch, pid) sequence.
    seqs, lengths, spans = _build_lstm_batch(ref_x_dict_list, FC_OUT)
    h_final = lstm_batch_pallas(seqs, lengths, prepared['lstm'])  # (K_pad, H) bf16

    # ONE lane-dense match call for all batch elements (pad + stack, bf16).
    max_count = max((c for _, c in spans), default=0)
    k_lane = _round_up(max_count + 1, 128)
    m_pad = _round_up(max(max(x_n), 1), 16)
    x_all = jnp.stack(
        [jnp.pad(x_split[b], ((0, m_pad - x_n[b]), (0, 0)))
         for b in range(batch_size)], axis=0)                     # (B, m_pad, F)
    h_rows = []
    for b in range(batch_size):
        start, count = spans[b]
        hb = h_final[start:start + count]                         # (count, H)
        # row 0 stays all-zero == the "non-match" dummy entry
        h_rows.append(jnp.pad(hb, ((1, k_lane - count - 1), (0, 0))))
    h_all = jnp.stack(h_rows, axis=0)                             # (B, k_lane, H)

    scores = match_batch_pallas(x_all, h_all)                     # (B, m_pad, k_lane)

    match_score = []
    for b in range(batch_size):
        _, count = spans[b]
        match_score.append(scores[b, :x_n[b], :count + 1])
    return match_score


# ----------------------------------------------------------------------------
# Pure-JAX f32 reference (same math, no Pallas) for a sanity check
# ----------------------------------------------------------------------------
def reference_forward(params, x, ref_x_list, x_n, ref_x_n_list, gt_pids_list):
    def linear(a, w, b, relu):
        y = a @ w.T + b
        return jnp.maximum(y, 0.0) if relu else y

    def lstm_cell(xt, h, c, wih, whh, bih, bhh):
        H = h.shape[-1]
        gates = xt @ wih.T + bih + h @ whh.T + bhh
        i = jax.nn.sigmoid(gates[:, :H])
        f = jax.nn.sigmoid(gates[:, H:2 * H])
        g = jnp.tanh(gates[:, 2 * H:3 * H])
        o = jax.nn.sigmoid(gates[:, 3 * H:])
        c_new = f * c + i * g
        return o * jnp.tanh(c_new), c_new

    batch_size = len(x_n)
    xf = x.reshape(x.shape[0], -1).astype(jnp.float32)
    ref_f_list = [r.reshape(r.shape[0], -1).astype(jnp.float32)
                  for r in ref_x_list]
    for idx, (w, b) in enumerate(params['query_fcs']):
        xf = linear(xf, w, b, idx < NUM_FCS - 1)
    for idx, (w, b) in enumerate(params['in_fcs']):
        ref_f_list = [linear(r, w, b, idx < NUM_FCS - 1) for r in ref_f_list]

    x_split = _split_rows(xf, x_n)
    ref_split_list = [_split_rows(r, n) for r, n in zip(ref_f_list, ref_x_n_list)]

    lp = params['lstm']
    match_score = []
    for b in range(batch_size):
        d = {}
        for i, ref_gt_pids in enumerate(gt_pids_list[:-1]):
            for j, pid in enumerate(ref_gt_pids[b]):
                if pid == 0:
                    continue
                d.setdefault(int(pid), []).append(ref_split_list[i][b][j:j + 1])
        h_rows = []
        for pid in sorted(d.keys()):
            seq = jnp.concatenate(d[pid], axis=0)
            h0 = c0 = h1 = c1 = jnp.zeros((1, HIDDEN), jnp.float32)
            for t in range(seq.shape[0]):
                xt = seq[t:t + 1]
                h0, c0 = lstm_cell(xt, h0, c0, lp['wih0'], lp['whh0'],
                                   lp['bih0'], lp['bhh0'])
                h1, c1 = lstm_cell(h0, h1, c1, lp['wih1'], lp['whh1'],
                                   lp['bih1'], lp['bhh1'])
            h_rows.append(h1)
        h_stack = jnp.concatenate(h_rows, axis=0)
        prod = x_split[b] @ h_stack.T
        dummy = jnp.zeros((prod.shape[0], 1), jnp.float32)
        match_score.append(jnp.concatenate([dummy, prod], axis=1))
    return match_score


# ----------------------------------------------------------------------------
# Demo
# ----------------------------------------------------------------------------
if __name__ == "__main__":
    key = jax.random.PRNGKey(0)
    k_x, k_r0, k_r1, k_r2, k_p = jax.random.split(key, 5)

    # Small shapes: in_channels=4, roi_feat_size=4 -> flattened dim 64
    C, R = 4, 4
    D_IN = C * R * R

    x_n = [3, 2]                                   # current-frame objects/img
    ref_x_n_list = [[2, 2], [2, 2], [2, 2]]        # objects/img per ref frame

    x = jax.random.normal(k_x, (sum(x_n), C, R, R), jnp.float32)
    ref_x_list = [
        jax.random.normal(k, (sum(n), C, R, R), jnp.float32)
        for k, n in zip([k_r0, k_r1, k_r2], ref_x_n_list)
    ]

    # gt_pids_list[i][b] = list of pids for frame i, batch b (0 -> ignored).
    # Last entry corresponds to the current frame (unused by forward).
    gt_pids_list = [
        [[1, 2], [1, 0]],     # reference frame 0
        [[2, 1], [2, 1]],     # reference frame 1
        [[1, 2], [1, 2]],     # reference frame 2
        [[1, 2, 3], [1, 2]],  # current frame
    ]

    params = init_params(k_p, D_IN)
    prepared = prepare_params(params, D_IN)

    match_score = track_head_forward(prepared, x, ref_x_list, x_n,
                                     ref_x_n_list, gt_pids_list)
    match_score = [jax.block_until_ready(s) for s in match_score]

    ref_score = reference_forward(params, x, ref_x_list, x_n,
                                  ref_x_n_list, gt_pids_list)
    for got, want in zip(match_score, ref_score):
        assert got.shape == want.shape, (got.shape, want.shape)
        if not bool(jnp.allclose(got, want, rtol=5e-2, atol=2e-3)):
            raise AssertionError("Pallas result mismatch vs reference")

    print("KERNEL_OK")
</pallas_src>

<mosaic_0001>
module attributes {stable_mosaic.version = 11 : i64} {
  func.func @_fc_stack_kernel(%arg0: i32, %arg1: memref<16x128xbf16, #tpu.memory_space<vmem>>, %arg2: memref<128x128xbf16, #tpu.memory_space<vmem>>, %arg3: memref<1x128xf32, #tpu.memory_space<vmem>>, %arg4: memref<128x128xbf16, #tpu.memory_space<vmem>>, %arg5: memref<1x128xf32, #tpu.memory_space<vmem>>, %arg6: memref<16x128xbf16, #tpu.memory_space<vmem>>) attributes {dimension_semantics = [#tpu.dimension_semantics<parallel>], iteration_bounds = array<i64: 1>, scalar_prefetch = 0 : i64, scratch_operands = 0 : i64, tpu.core_type = #tpu.core_type<tc>, window_params = [{transform_indices = @transform_0, window_bounds = array<i64: 16, 128>}, {pipeline_mode = #tpu.pipeline_mode<synchronous>, transform_indices = @transform_1, window_bounds = array<i64: 128, 128>}, {pipeline_mode = #tpu.pipeline_mode<synchronous>, transform_indices = @transform_2, window_bounds = array<i64: 1, 128>}, {pipeline_mode = #tpu.pipeline_mode<synchronous>, transform_indices = @transform_3, window_bounds = array<i64: 128, 128>}, {pipeline_mode = #tpu.pipeline_mode<synchronous>, transform_indices = @transform_4, window_bounds = array<i64: 1, 128>}, {transform_indices = @transform_5, window_bounds = array<i64: 16, 128>}]} {
    %c0 = arith.constant 0 : index
    %c0_0 = arith.constant 0 : index
    %0 = vector.load %arg1[%c0, %c0_0] : memref<16x128xbf16, #tpu.memory_space<vmem>>, vector<16x128xbf16>
    %c0_1 = arith.constant 0 : index
    %c0_2 = arith.constant 0 : index
    %1 = vector.load %arg2[%c0_1, %c0_2] : memref<128x128xbf16, #tpu.memory_space<vmem>>, vector<128x128xbf16>
    %cst = arith.constant dense<0.000000e+00> : vector<16x128xf32>
    %2 = tpu.matmul %0, %1, %cst {dimension_numbers = #tpu.dot_dimension_numbers<[1], [0], [0], [1], [0, 0, 1, 1], [], []>} : vector<16x128xbf16>, vector<128x128xbf16>, vector<16x128xf32> -> vector<16x128xf32>
    %c0_3 = arith.constant 0 : index
    %c0_4 = arith.constant 0 : index
    %3 = vector.load %arg3[%c0_3, %c0_4] : memref<1x128xf32, #tpu.memory_space<vmem>>, vector<1x128xf32>
    %4 = vector.broadcast %3 : vector<1x128xf32> to vector<16x128xf32>
    %5 = arith.addf %2, %4 : vector<16x128xf32>
    %cst_5 = arith.constant 0.000000e+00 : f32
    %6 = vector.broadcast %cst_5 : f32 to vector<16x128xf32>
    %7 = arith.maximumf %5, %6 : vector<16x128xf32>
    %8 = arith.truncf %7 : vector<16x128xf32> to vector<16x128xbf16>
    %c0_6 = arith.constant 0 : index
    %c0_7 = arith.constant 0 : index
    %9 = vector.load %arg4[%c0_6, %c0_7] : memref<128x128xbf16, #tpu.memory_space<vmem>>, vector<128x128xbf16>
    %cst_8 = arith.constant dense<0.000000e+00> : vector<16x128xf32>
    %10 = tpu.matmul %8, %9, %cst_8 {dimension_numbers = #tpu.dot_dimension_numbers<[1], [0], [0], [1], [0, 0, 1, 1], [], []>} : vector<16x128xbf16>, vector<128x128xbf16>, vector<16x128xf32> -> vector<16x128xf32>
    %c0_9 = arith.constant 0 : index
    %c0_10 = arith.constant 0 : index
    %11 = vector.load %arg5[%c0_9, %c0_10] : memref<1x128xf32, #tpu.memory_space<vmem>>, vector<1x128xf32>
    %12 = vector.broadcast %11 : vector<1x128xf32> to vector<16x128xf32>
    %13 = arith.addf %10, %12 : vector<16x128xf32>
    %14 = arith.truncf %13 : vector<16x128xf32> to vector<16x128xbf16>
    %c0_11 = arith.constant 0 : index
    %c0_12 = arith.constant 0 : index
    %15 = vector.load %arg6[%c0_11, %c0_12] : memref<16x128xbf16, #tpu.memory_space<vmem>>, vector<16x128xbf16>
    tpu.vector_store %arg6[%c0_11, %c0_12], %14 {strides = array<i32>} : memref<16x128xbf16, #tpu.memory_space<vmem>>, vector<16x128xbf16>,
    return
  }
  func.func @transform_0(%arg0: i32) -> (i32, i32) {
    %c0_i32 = arith.constant 0 : i32
    %c0_i32_0 = arith.constant 0 : i32
    return %arg0, %c0_i32 : i32, i32
  }
  func.func @transform_1(%arg0: i32) -> (i32, i32) {
    %c0_i32 = arith.constant 0 : i32
    %c0_i32_0 = arith.constant 0 : i32
    %c0_i32_1 = arith.constant 0 : i32
    return %c0_i32, %c0_i32_0 : i32, i32
  }
  func.func @transform_2(%arg0: i32) -> (i32, i32) {
    %c0_i32 = arith.constant 0 : i32
    %c0_i32_0 = arith.constant 0 : i32
    %c0_i32_1 = arith.constant 0 : i32
    return %c0_i32, %c0_i32_0 : i32, i32
  }
  func.func @transform_3(%arg0: i32) -> (i32, i32) {
    %c0_i32 = arith.constant 0 : i32
    %c0_i32_0 = arith.constant 0 : i32
    %c0_i32_1 = arith.constant 0 : i32
    return %c0_i32, %c0_i32_0 : i32, i32
  }
  func.func @transform_4(%arg0: i32) -> (i32, i32) {
    %c0_i32 = arith.constant 0 : i32
    %c0_i32_0 = arith.constant 0 : i32
    %c0_i32_1 = arith.constant 0 : i32
    return %c0_i32, %c0_i32_0 : i32, i32
  }
  func.func @transform_5(%arg0: i32) -> (i32, i32) {
    %c0_i32 = arith.constant 0 : i32
    %c0_i32_0 = arith.constant 0 : i32
    return %arg0, %c0_i32 : i32, i32
  }
}

</mosaic_0001>

<bundles_post_ra>
// kernel: tpu_custom_call.1
= control target key start
LH: loop header
LB: loop body
LE: loop exit
PB: predicated region body
PF: predicated region fallthrough
CT: control target
= control target key end

     0   :  { %10 = vsyncpa [#allocation3], 0  ;;  %s642_s0 = inlined_call_operand.hbm [shape: bf16[16,128], index: 0, kind: input, shape index: {}]   ;;  %s643_s1 = inlined_call_operand.hbm [shape: bf16[128,128], index: 1, kind: input, shape index: {}]   ;;  %s644_s2 = inlined_call_operand.vmem [shape: f32[1,128], index: 2, kind: input, shape index: {}]   ;;  %s645_s3 = inlined_call_operand.hbm [shape: bf16[128,128], index: 3, kind: input, shape index: {}]   ;;  %s646_s4 = inlined_call_operand.vmem [shape: f32[1,128], index: 4, kind: input, shape index: {}]   ;;  %s647_s5 = inlined_call_operand.hbm [shape: bf16[16,128], index: 5, kind: output, shape index: {}]  }
   0x1   :  { %11 = vsyncpa [#allocation6], 0 }
   0x2   :  { %12 = vsyncpa [#allocation4], 0  ;;  %s531_s18 = smov [#allocation5]   ;;  %s532_s20 = smov [#allocation2]  }
   0x3   :  { %s30_s19 = sshll.u32 %s531_s18, 4  ;;  %s18_s21 = sshll.u32 %s532_s20, 4  ;;  %s31_s19 = int_to_ptr.vmem [resolvable:$true] %s30_s19  ;;  %s569_s21 = int_to_ptr.vmem [resolvable:$true] %s18_s21 }
   0x4   :  { %s437_s24 = scalar_lea.hbm %s643_s1, 1024 }
   0x5   :  { %p438_p0 = scmp.ne.s32.totalorder %s643_s1, %s437_s24  ;;  %p441_p1 = scmp.lt.u32.totalorder %s437_s24, %s643_s1 }
   0x7   :  { %p443_p2 = pnand %p441_p1, %p438_p0 }
   0x9   :  { %446 = shalt.err (!%p443_p2)
}
   0xa   :  { %s447_s29 = scalar_lea.vmem %s31_s19, 1024  ;;  %p452_p4 = scmp.lt.s32.totalorder %s31_s19, %s31_s19 }
   0xb   :  { %p448_p3 = scmp.ne.s32.totalorder %s31_s19, %s447_s29  ;;  %p453_p5 = scmp.lt.s32.totalorder %s447_s29, %s447_s29 }
   0xd   :  { %p454_p6 = por %p453_p5, %p452_p4 }
   0xf   :  { %p455_p7 = pnand %p454_p6, %p448_p3 }
  0x11   :  { %458 = shalt.err (!%p455_p7)
}
  0x12   :  { %s533_s30 = smov 64   ;;  %s534_s6 = smov 4  }
  0x13   :  { %36 = dma.hbm_to_vmem [thread:$0]  %s643_s1, 1024, %s31_s19, [#allocation6], %s533_s30, %s533_s30, %s534_s6  }
  0x14   :  { %s459_s11 = scalar_lea.hbm %s642_s0, 128 }
  0x15   :  { %p460_p8 = scmp.ne.s32.totalorder %s642_s0, %s459_s11  ;;  %p463_p9 = scmp.lt.u32.totalorder %s459_s11, %s642_s0 }
  0x17   :  { %p465_p10 = pnand %p463_p9, %p460_p8 }
  0x19   :  { %468 = shalt.err (!%p465_p10)
}
  0x1a   :  { %s469_s16 = scalar_lea.vmem %s569_s21, 128  ;;  %p474_p12 = scmp.lt.s32.totalorder %s569_s21, %s569_s21 }
  0x1b   :  { %p470_p11 = scmp.ne.s32.totalorder %s569_s21, %s469_s16  ;;  %p475_p13 = scmp.lt.s32.totalorder %s469_s16, %s469_s16 }
  0x1d   :  { %p476_p0 = por %p475_p13, %p474_p12 }
  0x1f   :  { %p477_p1 = pnand %p476_p0, %p470_p11 }
  0x21   :  { %480 = shalt.err (!%p477_p1)
}
  0x22   :  { %24 = dma.hbm_to_vmem [thread:$0]  %s642_s0, 128, %s569_s21, [#allocation3], %s533_s30, %s533_s30, %s534_s6  }
  0x23   :  { %s535_s18 = smov [#allocation7]   ;;  %s481_s23 = scalar_lea.hbm %s645_s3, 1024 }
  0x24   :  { %s44_s19 = sshll.u32 %s535_s18, 4  ;;  %p482_p2 = scmp.ne.s32.totalorder %s645_s3, %s481_s23  ;;  %s45_s19 = int_to_ptr.vmem [resolvable:$true] %s44_s19 }
  0x25   :  { %p485_p3 = scmp.lt.u32.totalorder %s481_s23, %s645_s3 }
  0x27   :  { %p487_p4 = pnand %p485_p3, %p482_p2 }
  0x29   :  { %490 = shalt.err (!%p487_p4)
}
  0x2a   :  { %s491_s28 = scalar_lea.vmem %s45_s19, 1024  ;;  %p496_p6 = scmp.lt.s32.totalorder %s45_s19, %s45_s19 }
  0x2b   :  { %p492_p5 = scmp.ne.s32.totalorder %s45_s19, %s491_s28  ;;  %p497_p7 = scmp.lt.s32.totalorder %s491_s28, %s491_s28 }
  0x2d   :  { %p498_p8 = por %p497_p7, %p496_p6 }
  0x2f   :  { %p499_p9 = pnand %p498_p8, %p492_p5 }
  0x31   :  { %502 = shalt.err (!%p499_p9)
}
  0x32   :  { %50 = dma.hbm_to_vmem [thread:$0]  %s645_s3, 1024, %s45_s19, [#allocation6], %s533_s30, %s533_s30, %s534_s6  }
  0x33   :  { %525 = dma.done.wait [#allocation3], 128  }
  0x34   :  { %526 = vsyncadd [#allocation3], 4294967168 }
  0x35   :  { %527 = dma.done.wait [#allocation6], 2048  }
  0x36   :  { %528 = vsyncadd [#allocation6], 4294965248  ;;  %v536_v0 = vmov 0.0   ;;  %vm537_vm0 = vmmov 0   ;;  %v420_v1 = vld [vmem:[#allocation5] sm:$0xff]   ;;  %v421_v2 = vld [vmem:[#allocation5 + $0x8] sm:$0xff]  }
  0x37   :  { %372 = vmatprep.subr.bf16.mxu0 %v536_v0  ;;  %388 = vmatprep.mubr.msk.bf16.mxu0 %vm537_vm0, %v536_v0  ;;  %v422_v3 = vld [vmem:[#allocation5 + $0x10] sm:$0xff]   ;;  %v429_v4 = vld [vmem:[#allocation7] sm:$0xff]   ;;  %v423_v5 = vld [vmem:[#allocation5 + $0x18] sm:$0xff]   ;;  %s538_s9 = smov [#allocation8]  }
  0x38   :  { %392 = vmatprep.subr.bf16.mxu1 %v536_v0  ;;  %408 = vmatprep.mubr.msk.bf16.mxu1 %vm537_vm0, %v536_v0  ;;  %v430_v6 = vld [vmem:[#allocation7 + $0x8] sm:$0xff]   ;;  %v424_v7 = vld [vmem:[#allocation5 + $0x20] sm:$0xff]   ;;  %v431_v8 = vld [vmem:[#allocation7 + $0x10] sm:$0xff]   ;;  %s313_s10 = sshll.u32 %s538_s9, 4  ;;  %s314_s10 = int_to_ptr.vmem [resolvable:$true] %s313_s10 }
  0x39   :  { %373 = vmatpush3.bf16.msra.mxu0 %v420_v1  ;;  %393 = vmatpush3.bf16.msra.mxu1 %v429_v4  ;;  %v425_v9 = vld [vmem:[#allocation5 + $0x28] sm:$0xff]   ;;  %v432_v10 = vld [vmem:[#allocation7 + $0x18] sm:$0xff]   ;;  %v426_v11 = vld [vmem:[#allocation5 + $0x30] sm:$0xff]   ;;  %p508_p11 = scmp.lt.s32.totalorder %s314_s10, %s314_s10 }
  0x3a   :  { %374 = vmatprep.subr.bf16.mxu0 %v536_v0  ;;  %394 = vmatprep.subr.bf16.mxu1 %v536_v0  ;;  %v433_v12 = vld [vmem:[#allocation7 + $0x20] sm:$0xff]   ;;  %v427_v13 = vld [vmem:[#allocation5 + $0x38] sm:$0xff]   ;;  %v434_v14 = vld [vmem:[#allocation7 + $0x28] sm:$0xff]  }
  0x3b   :  { %v428_v15 = vld [vmem:[#allocation2] sm:$0xff]   ;;  %v435_v16 = vld [vmem:[#allocation7 + $0x30] sm:$0xff]  }
  0x3c   :  { %v436_v17 = vld [vmem:[#allocation7 + $0x38] sm:$0xff]  }
  0x3d   :  { %375 = vmatpush3.bf16.msra.mxu0 %v421_v2  ;;  %395 = vmatpush3.bf16.msra.mxu1 %v430_v6  ;;  %v326_v18 = vld [vmem:[%s644_s2] ss:$0 sm:$0xff]  ;;  %s503_s2 = scalar_lea.vmem %s314_s10, 128 }
  0x3e   :  { %376 = vmatprep.subr.bf16.mxu0 %v536_v0  ;;  %396 = vmatprep.subr.bf16.mxu1 %v536_v0  ;;  %v336_v28 = vld [vmem:[%s646_s4] ss:$0 sm:$0xff]  ;;  %p504_p10 = scmp.ne.s32.totalorder %s314_s10, %s503_s2  ;;  %p509_p12 = scmp.lt.s32.totalorder %s503_s2, %s503_s2 }
  0x40   :  { %p510_p13 = por %p509_p12, %p508_p11 }
  0x41   :  { %377 = vmatpush3.bf16.msra.mxu0 %v422_v3  ;;  %397 = vmatpush3.bf16.msra.mxu1 %v431_v8 }
  0x42   :  { %378 = vmatprep.subr.bf16.mxu0 %v536_v0  ;;  %398 = vmatprep.subr.bf16.mxu1 %v536_v0  ;;  %p511_p0 = pnand %p510_p13, %p504_p10 }
  0x45   :  { %379 = vmatpush3.bf16.msra.mxu0 %v423_v5  ;;  %399 = vmatpush3.bf16.msra.mxu1 %v432_v10 }
  0x46   :  { %380 = vmatprep.subr.bf16.mxu0 %v536_v0  ;;  %400 = vmatprep.subr.bf16.mxu1 %v536_v0 }
  0x49   :  { %381 = vmatpush3.bf16.msra.mxu0 %v424_v7  ;;  %401 = vmatpush3.bf16.msra.mxu1 %v433_v12 }
  0x4a   :  { %382 = vmatprep.subr.bf16.mxu0 %v536_v0  ;;  %402 = vmatprep.subr.bf16.mxu1 %v536_v0 }
  0x4d   :  { %383 = vmatpush3.bf16.msra.mxu0 %v425_v9  ;;  %403 = vmatpush3.bf16.msra.mxu1 %v434_v14 }
  0x4e   :  { %384 = vmatprep.subr.bf16.mxu0 %v536_v0  ;;  %404 = vmatprep.subr.bf16.mxu1 %v536_v0 }
  0x51   :  { %385 = vmatpush3.bf16.msra.mxu0 %v426_v11  ;;  %405 = vmatpush3.bf16.msra.mxu1 %v435_v16 }
  0x52   :  { %386 = vmatprep.subr.bf16.mxu0 %v536_v0  ;;  %406 = vmatprep.subr.bf16.mxu1 %v536_v0 }
  0x55   :  { %387 = vmatpush3.bf16.msra.mxu0 %v427_v13  ;;  %407 = vmatpush3.bf16.msra.mxu1 %v436_v17 }
  0x58   :  { %389 = vmatmul.mubr.bf16.vlgmr.msra.gmra.mrb[0].mxu0 %v428_v15 }
 0x12b   :  { %v176_v19 = vpop.f32.mrb[0].mxu0 }
 0x12c   :  { %v177_v20 = vadd.f32 %v326_v18, %v176_v19  ;;  %v390_v21 = vpop.f32.mrb[1].mxu0 }
 0x12d   :  { %v179_v22 = vpop.f32.mrb[2].mxu0 }
 0x12e   :  { %v180_v23 = vadd.f32 %v326_v18, %v179_v22  ;;  %v391_v24 = vpop.f32.mrb[3].mxu0  ;;  %v183_v25 = vmax.f32 %v177_v20, 0.0 }
 0x130   :  { %v184_v26 = vmax.f32 %v180_v23, 0.0 }
 0x132   :  { %v185_v27 = vpack.c.bf16 %v184_v26, %v183_v25 }
 0x134   :  { %409 = vmatmul.mubr.bf16.vlgmr.msra.gmra.mrb[0].mxu1 %v185_v27 }
 0x207   :  { %v291_v29 = vpop.f32.mrb[0].mxu1 }
 0x208   :  { %v410_v30 = vpop.f32.mrb[1].mxu1  ;;  %v292_v32 = vadd.f32 %v336_v28, %v291_v29 }
 0x209   :  { %v294_v31 = vpop.f32.mrb[2].mxu1 }
 0x20a   :  { %v295_v33 = vadd.f32 %v336_v28, %v294_v31  ;;  %v411_v34 = vpop.f32.mrb[3].mxu1 }
 0x20c   :  { %v352_v35 = vpack.c.bf16 %v295_v33, %v292_v32 }
 0x20e   :  { %353 = vst [vmem:[#allocation8] sm:$0xff] %v352_v35  }
 0x20f   :  { %514 = shalt.err (!%p511_p0)
}
 0x210   :  { %s515_s12 = scalar_lea.hbm %s647_s5, 128 }
 0x211   :  { %p516_p1 = scmp.ne.s32.totalorder %s647_s5, %s515_s12  ;;  %p519_p2 = scmp.lt.u32.totalorder %s515_s12, %s647_s5 }
 0x213   :  { %p521_p3 = pnand %p519_p2, %p516_p1 }
 0x215   :  { %524 = shalt.err (!%p521_p3)
}
 0x216   :  { %319 = dma.vmem_to_hbm [thread:$0]  %s314_s10, 128, %s647_s5, [#allocation4], %s533_s30, %s533_s30, %s534_s6  }
 0x217   :  { %529 = dma.done.wait [#allocation4], 128  }
 0x218   :  { %530 = vsyncadd [#allocation4], 4294967168 }
 0x219   :  { %323 = vsyncpa [#allocation3], 1 }
 0x21a   :  { %324 = vsyncpa [#allocation6], 1 }
 0x21b   :  { %325 = vsyncpa [#allocation4], 1 }

</bundles_post_ra>
